<compile_context>
chip_gen: v5e
topology: v5e:2x2
jax: 0.10.0
libtpu: 0.0.40
codegen_flags: <defaults>
</compile_context>

<pallas_src>
import functools

import numpy as np
import jax
import jax.numpy as jnp
from jax import lax
from jax.experimental import pallas as pl
from jax.experimental.pallas import tpu as pltpu


# ---------------------------------------------------------------------------
# One-off probe: pin down pltpu.roll's rotation direction on this backend.
# (Cached per process; this script only ever targets the default TPU backend.)
# ---------------------------------------------------------------------------
@functools.lru_cache(maxsize=1)
def _roll_matches_jnp() -> bool:
    def probe(x_ref, o_ref):
        o_ref[...] = pltpu.roll(x_ref[...], 1, axis=1)

    x = jnp.broadcast_to(lax.iota(jnp.float32, 128)[None, :], (8, 128))
    out = pl.pallas_call(
        probe, out_shape=jax.ShapeDtypeStruct((8, 128), jnp.float32))(x)
    first = float(out[0, 0])
    if first == 127.0:
        return True      # same convention as jnp.roll (shift toward higher idx)
    if first == 1.0:
        return False     # opposite rotation direction
    raise RuntimeError(f"unexpected pltpu.roll semantics: out[0,0]={first}")


# ---------------------------------------------------------------------------
# Kernel (trace-time Python helpers, all static shapes).
# ---------------------------------------------------------------------------
def _lrelu(x, slope):
    return jnp.where(x >= 0, x, slope * x)


def _inv_block_kernel(x_ref, mask_ref, winv_ref, w_ref, b_ref, o_ref, *,
                      width, d, clamp, slope, roll_jnp, c1, c2):
    """One grid step = `group` images flattened lane-dense as (C, L)."""
    L = x_ref.shape[-1]
    K1, K2 = 9 * c1, 9 * c2

    x = x_ref[0]                              # (C, L) f32
    masks = mask_ref[...]                     # (9*(c1+c2), L) bf16
    mask_c1 = masks[0:K1]                     # for patches with Cin = c1
    mask_c2 = masks[K1:K1 + K2]               # for patches with Cin = c2
    W = w_ref[...]                            # (Rw, Kmax) bf16 weight slab
    B = b_ref[...]                            # (Rb, 1)    f32 bias slab

    def patches(act, mask):
        """(Cin, L) f32 -> masked bf16 im2col patches (9*Cin, L).

        Dilated 3x3 taps via XLU lane rotations of the flattened image; image
        boundary zero-padding comes from the packed 0/1 mask (one multiply)."""
        xb = act.astype(jnp.bfloat16)         # bf16 BEFORE roll: halves vreg traffic
        taps = []
        for ky in range(3):
            for kx in range(3):
                off = (ky - 1) * d * width + (kx - 1) * d
                if off == 0:
                    taps.append(xb)
                else:
                    shift = (-off) % L if roll_jnp else off % L
                    taps.append(pltpu.roll(xb, shift, axis=1))
        return jnp.concatenate(taps, axis=0) * mask

    # ---- invertible 1x1 conv: ONE matmul (kept in f32 for flow parity) ----
    z = jnp.dot(winv_ref[...], x, preferred_element_type=jnp.float32)  # (C, L)
    x1 = z[0:c1]
    x2 = z[c1:c1 + c2]

    # static row offsets in the packed weight / bias slabs
    rF1, rF2 = 0, 2 * c1
    rHG1 = 3 * c1
    rH2 = 3 * c1 + 4 * c2
    rG2 = 3 * c1 + 5 * c2

    # ---- F(x2): conv1 + identity fused in one matmul ----
    p_x2 = patches(x2, mask_c2)                                   # (9*c2, L)
    t = jnp.dot(W[rF1:rF1 + 2 * c1, :K2], p_x2,
                preferred_element_type=jnp.float32) + B[rF1:rF1 + 2 * c1]
    hF = _lrelu(t[0:c1], slope)
    idF = t[c1:2 * c1]
    p_hF = patches(hF, mask_c1)
    f_out = _lrelu(jnp.dot(W[rF2:rF2 + c1, :K1], p_hF,
                           preferred_element_type=jnp.float32)
                   + B[rF2:rF2 + c1], slope) + idF
    y1 = x1 + f_out                                               # (c1, L) f32

    # ---- H(y1) and G(y1): SHARED patches, stacked conv1+identity matmul ----
    p_y1 = patches(y1, mask_c1)                                   # (9*c1, L)
    t = jnp.dot(W[rHG1:rHG1 + 4 * c2, :K1], p_y1,
                preferred_element_type=jnp.float32) + B[rHG1:rHG1 + 4 * c2]
    hH = _lrelu(t[0:c2], slope)
    hG = _lrelu(t[c2:2 * c2], slope)
    idH = t[2 * c2:3 * c2]
    idG = t[3 * c2:4 * c2]

    p_hH = patches(hH, mask_c2)
    h_out = _lrelu(jnp.dot(W[rH2:rH2 + c2, :K2], p_hH,
                           preferred_element_type=jnp.float32)
                   + B[rH2:rH2 + c2], slope) + idH

    p_hG = patches(hG, mask_c2)
    g_out = _lrelu(jnp.dot(W[rG2:rG2 + c2, :K2], p_hG,
                           preferred_element_type=jnp.float32)
                   + B[rG2:rG2 + c2], slope) + idG

    # ---- affine coupling: s = clamp*(2*sigmoid(h)-1) == clamp*tanh(h/2) ----
    s = clamp * jnp.tanh(0.5 * h_out)
    y2 = x2 * jnp.exp(s) + g_out

    # direct row-slice stores (no concat before store)
    o_ref[0, 0:c1, :] = y1
    o_ref[0, c1:c1 + c2, :] = y2


# ---------------------------------------------------------------------------
# Host-side packing helpers.
# ---------------------------------------------------------------------------
def _const_map(n, *, ndim):
    return (0,) * ndim


def _tap_masks(H, W, d):
    """(9, H*W) 0/1 validity masks for the dilated 3x3 taps (zero padding)."""
    hw = H * W
    yy, xx = np.divmod(np.arange(hw), W)
    m = np.ones((9, hw), np.float32)
    for ky in range(3):
        for kx in range(3):
            dy, dx = (ky - 1) * d, (kx - 1) * d
            ok = (yy + dy >= 0) & (yy + dy < H) & (xx + dx >= 0) & (xx + dx < W)
            m[ky * 3 + kx] = ok.astype(np.float32)
    return m


def _pack_params(pF, pH, pG, c1, c2):
    """Pack all conv weights into one bf16 slab and biases into one f32 slab."""
    K1, K2 = 9 * c1, 9 * c2
    kmax = max(K1, K2)

    def tap(w):                                  # OIHW 3x3 -> (Cout, 9*Cin)
        co, ci = w.shape[:2]
        return jnp.transpose(w, (0, 2, 3, 1)).reshape(co, 9 * ci)

    def idtap(wid, cin):                         # 1x1 conv -> center-tap columns
        co = wid.shape[0]
        z = jnp.zeros((co, 9 * cin), jnp.float32)
        return z.at[:, 4 * cin:5 * cin].set(wid.reshape(co, cin))

    def padk(w):
        return jnp.pad(w, ((0, 0), (0, kmax - w.shape[1])))

    blocks = [
        padk(tap(pF["w1"])),          # F conv1          (c1, K2)
        padk(idtap(pF["wid"], c2)),   # F identity       (c1, K2)
        padk(tap(pF["w2"])),          # F conv2          (c1, K1)
        padk(tap(pH["w1"])),          # H conv1          (c2, K1)
        padk(tap(pG["w1"])),          # G conv1          (c2, K1)
        padk(idtap(pH["wid"], c1)),   # H identity       (c2, K1)
        padk(idtap(pG["wid"], c1)),   # G identity       (c2, K1)
        padk(tap(pH["w2"])),          # H conv2          (c2, K2)
        padk(tap(pG["w2"])),          # G conv2          (c2, K2)
    ]
    w_slab = jnp.concatenate(blocks, axis=0).astype(jnp.bfloat16)
    b_slab = jnp.concatenate([
        pF["b1"], pF["bid"], pF["b2"],
        pH["b1"], pG["b1"], pH["bid"], pG["bid"],
        pH["b2"], pG["b2"]]).reshape(-1, 1).astype(jnp.float32)
    return w_slab, b_slab


def _choose_group(N, hw, target_lanes=2048, min_tiles=2):
    """Images folded into the lane axis per grid step (keeps >=2 steps for v7x)."""
    g = max(1, target_lanes // hw)
    if N >= min_tiles:
        g = min(g, max(1, N // min_tiles))
    g = max(1, min(g, N))
    while N % g:
        g -= 1
    return g


def _vmem_budget(C, c1, c2, L):
    blk = C * L * 4
    mask = 9 * (c1 + c2) * L * 2
    patch = 9 * max(c1, c2) * L * 2
    temps = 10 * max(c1, c2, 1) * L * 4
    need = 2 * 2 * blk + 2 * mask + 3 * patch + temps
    return int(min(max(4 * need, 8 << 20), 48 << 20))


def inv_block(x_nchw, winv, pF, pH, pG, *, split_len1, d=1, clamp=0.8,
              slope=0.1, group=None):
    """InvBlock forward (rev=False). x_nchw: (N, C, H, W) float32."""
    N, C, H, W = x_nchw.shape
    c1 = split_len1
    c2 = C - c1
    hw = H * W
    if group is None:
        group = _choose_group(N, hw)
    assert N % group == 0
    steps = N // group
    L = group * hw
    # TODO(synk): for very large H*W (where a whole image tile exceeds the v7x
    # 64 MiB VMEM) additionally tile the pixel axis with a d-row halo.

    # lane-dense layout: (steps, C, group*H*W); pixels (and grouped images) on lanes
    x_flat = (x_nchw.reshape(steps, group, C, hw)
              .transpose(0, 2, 1, 3).reshape(steps, C, L))

    base = np.tile(_tap_masks(H, W, d), (1, group))               # (9, L)
    mask_slab = jnp.asarray(
        np.concatenate([np.repeat(base, c1, axis=0),
                        np.repeat(base, c2, axis=0)], axis=0)).astype(jnp.bfloat16)

    w_slab, b_slab = _pack_params(pF, pH, pG, c1, c2)
    winv_f32 = winv.astype(jnp.float32)

    kernel = functools.partial(
        _inv_block_kernel, width=W, d=d, clamp=clamp, slope=slope,
        roll_jnp=_roll_matches_jnp(), c1=c1, c2=c2)

    consts = [mask_slab, winv_f32, w_slab, b_slab]
    in_specs = [pl.BlockSpec((1, C, L), lambda n: (n, 0, 0))]
    in_specs += [pl.BlockSpec(a.shape, functools.partial(_const_map, ndim=a.ndim))
                 for a in consts]

    macs_per_lane = (C * C + 2 * c1 * 9 * c2 + c1 * 9 * c1
                     + 4 * c2 * 9 * c1 + 2 * c2 * 9 * c2)
    cost = pl.CostEstimate(
        flops=int(2 * macs_per_lane * N * hw),
        transcendentals=int(2 * c2 * N * hw),
        bytes_accessed=int(8 * C * N * hw + 4 * winv_f32.size
                           + 2 * w_slab.size + 4 * b_slab.size
                           + 2 * mask_slab.size))

    out_flat = pl.pallas_call(
        kernel,
        out_shape=jax.ShapeDtypeStruct((steps, C, L), jnp.float32),
        grid_spec=pltpu.PrefetchScalarGridSpec(
            num_scalar_prefetch=0,
            grid=(steps,),
            in_specs=in_specs,
            out_specs=pl.BlockSpec((1, C, L), lambda n: (n, 0, 0)),
        ),
        compiler_params=pltpu.CompilerParams(
            dimension_semantics=("parallel",),
            vmem_limit_bytes=_vmem_budget(C, c1, c2, L)),
        cost_estimate=cost,
    )(x_flat, *consts)

    return (out_flat.reshape(steps, C, group, hw)
            .transpose(0, 2, 1, 3).reshape(N, C, H, W))


# ---------------------------------------------------------------------------
# Pure-JAX reference (NCHW), mirroring the torch forward.
# ---------------------------------------------------------------------------
def _conv2d_ref(x, w, b, dil, pad):
    y = lax.conv_general_dilated(
        x, w, window_strides=(1, 1), padding=[(pad, pad), (pad, pad)],
        rhs_dilation=(dil, dil),
        dimension_numbers=("NCHW", "OIHW", "NCHW"),
        precision=lax.Precision.HIGHEST)
    return y + b.reshape(1, -1, 1, 1)


def _subnet_ref(x, p, d, slope):
    h = _conv2d_ref(x, p["w1"], p["b1"], d, d)
    h = jnp.where(h >= 0, h, slope * h)
    h = _conv2d_ref(h, p["w2"], p["b2"], d, d)
    h = jnp.where(h >= 0, h, slope * h)
    return h + _conv2d_ref(x, p["wid"], p["bid"], 1, 0)


def _inv_block_ref(x, winv, pF, pH, pG, *, split_len1, d, clamp, slope):
    z = jnp.einsum("oc,nchw->nohw", winv, x, precision=lax.Precision.HIGHEST)
    x1, x2 = z[:, :split_len1], z[:, split_len1:]
    y1 = x1 + _subnet_ref(x2, pF, d, slope)
    s = clamp * (jax.nn.sigmoid(_subnet_ref(y1, pH, d, slope)) * 2.0 - 1.0)
    y2 = x2 * jnp.exp(s) + _subnet_ref(y1, pG, d, slope)
    return jnp.concatenate([y1, y2], axis=1)


if __name__ == "__main__":
    N, C, H, W = 2, 4, 16, 16      # batch 2, channel_num 4, 16x16 spatial
    c1 = 2                         # channel_split_num
    c2 = C - c1
    d = 1
    clamp = 0.8
    slope = 0.1                    # LeakyReLU slope inside UNetConvBlock

    key = jax.random.PRNGKey(0)
    ks = jax.random.split(key, 8)

    x = jax.random.normal(ks[0], (N, C, H, W), jnp.float32)

    # InvertibleConv1x1 weight, LU-decomposed parametrization:
    #   W = P @ L @ (U + diag(sign_s * exp(log_s)))
    perm = jax.random.permutation(ks[1], C)
    P = jnp.eye(C, dtype=jnp.float32)[perm]
    Lm = jnp.tril(0.1 * jax.random.normal(ks[2], (C, C), jnp.float32), -1) + jnp.eye(C)
    U = jnp.triu(0.1 * jax.random.normal(ks[3], (C, C), jnp.float32), 1)
    log_s = 0.1 * jax.random.normal(ks[4], (C,), jnp.float32)
    sign_s = jnp.where(jnp.arange(C) % 2 == 0, 1.0, -1.0)
    winv = P @ Lm @ (U + jnp.diag(sign_s * jnp.exp(log_s)))

    def make_subnet(k, cin, cout):
        k1, k2, k3, k4, k5, k6 = jax.random.split(k, 6)
        return dict(
            w1=0.1 * jax.random.normal(k1, (cout, cin, 3, 3), jnp.float32),
            b1=0.1 * jax.random.normal(k2, (cout,), jnp.float32),
            w2=0.1 * jax.random.normal(k3, (cout, cout, 3, 3), jnp.float32),
            b2=0.1 * jax.random.normal(k4, (cout,), jnp.float32),
            wid=0.1 * jax.random.normal(k5, (cout, cin, 1, 1), jnp.float32),
            bid=0.1 * jax.random.normal(k6, (cout,), jnp.float32))

    pF = make_subnet(ks[5], c2, c1)    # F : split_len2 -> split_len1
    pH = make_subnet(ks[6], c1, c2)    # H : split_len1 -> split_len2
    pG = make_subnet(ks[7], c1, c2)    # G : split_len1 -> split_len2

    out = inv_block(x, winv, pF, pH, pG, split_len1=c1, d=d, clamp=clamp,
                    slope=slope)
    out = jax.block_until_ready(out)

    ref = _inv_block_ref(x, winv, pF, pH, pG, split_len1=c1, d=d, clamp=clamp,
                         slope=slope)
    assert out.shape == (N, C, H, W)
    err = float(jnp.max(jnp.abs(out - ref)))
    assert jnp.allclose(out, ref, atol=5e-2, rtol=5e-2), f"max abs err {err}"
    print("KERNEL_OK")
</pallas_src>

<mosaic_0001>
module attributes {stable_mosaic.version = 11 : i64} {
  func.func @probe(%arg0: memref<8x128xf32, #tpu.memory_space<vmem>>, %arg1: memref<8x128xf32, #tpu.memory_space<vmem>>) attributes {dimension_semantics = [], scalar_prefetch = 0 : i64, scratch_operands = 0 : i64, tpu.core_type = #tpu.core_type<tc>} {
    %c0 = arith.constant 0 : index
    %c0_0 = arith.constant 0 : index
    %0 = vector.load %arg0[%c0, %c0_0] : memref<8x128xf32, #tpu.memory_space<vmem>>, vector<8x128xf32>
    %c1_i32 = arith.constant 1 : i32
    %1 = tpu.dynamic_rotate %0 by %c1_i32 dim 1 : vector<8x128xf32>, i32 -> vector<8x128xf32>
    %c0_1 = arith.constant 0 : index
    %c0_2 = arith.constant 0 : index
    %2 = vector.load %arg1[%c0_1, %c0_2] : memref<8x128xf32, #tpu.memory_space<vmem>>, vector<8x128xf32>
    tpu.vector_store %arg1[%c0_1, %c0_2], %1 {strides = array<i32>} : memref<8x128xf32, #tpu.memory_space<vmem>>, vector<8x128xf32>,
    return
  }
}

</mosaic_0001>

<bundles_post_ra>
// kernel: tpu_custom_call.1
= control target key start
LH: loop header
LB: loop body
LE: loop exit
PB: predicated region body
PF: predicated region fallthrough
CT: control target
= control target key end

     0   :  { %6 = vsyncpa [#allocation3], 0  ;;  %s118_s0 = inlined_call_operand.hbm [shape: f32[8,128], index: 0, kind: input, shape index: {}]   ;;  %s119_s1 = inlined_call_operand.hbm [shape: f32[8,128], index: 1, kind: output, shape index: {}]  }
   0x1   :  { %7 = vsyncpa [#allocation4], 0  ;;  %s13_s8 = sshll.u32 %s118_s0, 4  ;;  %s99_s9 = smov [#allocation2]   ;;  %s14_s8 = int_to_ptr.hbm [resolvable:$true] %s13_s8 }
   0x2   :  { %s15_s10 = sshll.u32 %s99_s9, 4  ;;  %s16_s10 = int_to_ptr.vmem [resolvable:$true] %s15_s10 }
   0x3   :  { %18 = dma.hbm_to_vmem [thread:$0]  %s14_s8, 128, %s16_s10, [#allocation3]  }
   0x4   :  { %95 = dma.done.wait [#allocation3], 128  }
   0x5   :  { %96 = vsyncadd [#allocation3], 4294967168  ;;  %v23_v0 = vld [vmem:[#allocation2] sm:$0xff]  ;;  %s100_s11 = smov 1   ;;  %s101_s12 = smov [#allocation5]  }
   0x6   :  { %24 = vrot.lane.b32.xlu0 %v23_v0, %s100_s11  ;;  %s32_s13 = sshll.u32 %s101_s12, 4  ;;  %s34_s16 = sshll.u32 %s119_s1, 4  ;;  %s33_s13 = int_to_ptr.vmem [resolvable:$true] %s32_s13  ;;  %s35_s16 = int_to_ptr.hbm [resolvable:$true] %s34_s16 }
  0x78   :  { %v25_v1 = vpop.permute.xlu0 %24 }
  0x79   :  { %26 = vst [vmem:[#allocation5] sm:$0xff] %v25_v1 }
  0x7a   :  { %37 = dma.vmem_to_hbm [thread:$0]  %s33_s13, 128, %s35_s16, [#allocation4]  }
  0x7b   :  { %97 = dma.done.wait [#allocation4], 128  }
  0x7c   :  { %98 = vsyncadd [#allocation4], 4294967168 }
  0x7d   :  { %42 = vsyncpa [#allocation3], 1 }
  0x7e   :  { %43 = vsyncpa [#allocation4], 1 }

</bundles_post_ra>
